<compile_context>
chip_gen: v6e
topology: v6e:2x2x1
jax: 0.10.0
libtpu: 0.0.40
codegen_flags: <defaults>
</compile_context>

<pallas_src>
import jax
import jax.numpy as jnp
from jax.experimental import pallas as pl
from jax.experimental.pallas import tpu as pltpu


def _round_up(x, m):
    return ((x + m - 1) // m) * m


def policy_kernel(s_ref, mean_ref, inv_std_ref,
                  w1_ref, b1_ref, w2_ref, b2_ref, w3_ref, b3_ref,
                  o_ref):
    # Input normalization + clamp in f32 on the VPU (multiply by precomputed 1/std).
    x = (s_ref[...] - mean_ref[...]) * inv_std_ref[...]
    x = jnp.clip(x, -5.0, 5.0)

    # Layer 1: bf16 operands into the MXU, f32 accumulation; bias + ReLU in f32.
    h1 = jnp.dot(x.astype(jnp.bfloat16), w1_ref[...],
                 preferred_element_type=jnp.float32) + b1_ref[...]
    h1 = jnp.maximum(h1, 0.0)

    # Layer 2: Linear + ReLU.
    h2 = jnp.dot(h1.astype(jnp.bfloat16), w2_ref[...],
                 preferred_element_type=jnp.float32) + b2_ref[...]
    h2 = jnp.maximum(h2, 0.0)

    # Output layer: only the "means" half of the 2*A head is needed by forward(); the
    # wrapper passes pre-sliced W3[:, :A], b3[:A] (pure glue, same math).
    means = jnp.dot(h2.astype(jnp.bfloat16), w3_ref[...],
                    preferred_element_type=jnp.float32) + b3_ref[...]
    o_ref[...] = jnp.tanh(means)


def state_dependent_policy_forward(states, mean, std, params, *, tm=256):
    """states: (B, D) f32.  mean/std: (D,) f32.  params: dict of MLP weights (f32)."""
    B, D = states.shape
    A = params["w3"].shape[1] // 2

    # ---- wrapper-side glue (layout / constant folding only) ----
    mean2 = mean.reshape(1, D).astype(jnp.float32)
    inv_std2 = (1.0 / std).reshape(1, D).astype(jnp.float32)

    # bf16 matmul operands (accumulation stays f32 inside the kernel).
    w1 = params["w1"].astype(jnp.bfloat16)
    w2 = params["w2"].astype(jnp.bfloat16)
    w3_means = params["w3"][:, :A].astype(jnp.bfloat16)
    b1 = params["b1"].reshape(1, -1).astype(jnp.float32)
    b2 = params["b2"].reshape(1, -1).astype(jnp.float32)
    b3_means = params["b3"][:A].reshape(1, A).astype(jnp.float32)

    H1 = w1.shape[1]
    H2 = w2.shape[1]

    # Batch tile: feed the MXU (>=128/256 rows) for real batches, but don't blow up a
    # tiny demo batch.  Keep it a multiple of 8 sublanes; pad B so every tile is full.
    TM = min(tm, _round_up(B, 8))
    Bp = _round_up(B, TM)
    if Bp != B:
        states = jnp.pad(states, ((0, Bp - B), (0, 0)))

    tile_map = lambda i: (i, 0)    # activation tiles walk the batch
    const_map = lambda i: (0, 0)   # weights/stats stay resident across grid steps

    out = pl.pallas_call(
        policy_kernel,
        out_shape=jax.ShapeDtypeStruct((Bp, A), jnp.float32),
        grid=(Bp // TM,),
        in_specs=[
            pl.BlockSpec((TM, D), tile_map),    # states tile
            pl.BlockSpec((1, D), const_map),    # mean
            pl.BlockSpec((1, D), const_map),    # 1/std
            pl.BlockSpec((D, H1), const_map),   # w1 (bf16)
            pl.BlockSpec((1, H1), const_map),   # b1
            pl.BlockSpec((H1, H2), const_map),  # w2 (bf16)
            pl.BlockSpec((1, H2), const_map),   # b2
            pl.BlockSpec((H2, A), const_map),   # w3 (means half, bf16)
            pl.BlockSpec((1, A), const_map),    # b3 (means half)
        ],
        out_specs=pl.BlockSpec((TM, A), tile_map),
        compiler_params=pltpu.CompilerParams(
            dimension_semantics=("parallel",),
        ),
    )(states, mean2, inv_std2, w1, b1, w2, b2, w3_means, b3_means)
    return out[:B]


def init_params(key, state_dim, action_dim, hidden_units=(256, 256)):
    """Deterministic synthetic init (shapes match build_mlp in the torch module)."""
    dims = [state_dim, *hidden_units, 2 * action_dim]
    params = {}
    for li, (d_in, d_out) in enumerate(zip(dims[:-1], dims[1:]), start=1):
        key, kw, kb = jax.random.split(key, 3)
        scale = 1.0 / jnp.sqrt(jnp.float32(d_in))
        params[f"w{li}"] = jax.random.uniform(kw, (d_in, d_out), jnp.float32, -scale, scale)
        params[f"b{li}"] = jax.random.uniform(kb, (d_out,), jnp.float32, -scale, scale)
    return params


def reference_forward_bf16(states, mean, std, params):
    """Pure-JAX reference matching the kernel math (bf16 matmul operands, f32 acc)."""
    x = jnp.clip((states - mean) / std, -5.0, 5.0)
    A = params["w3"].shape[1] // 2
    w1 = params["w1"].astype(jnp.bfloat16)
    w2 = params["w2"].astype(jnp.bfloat16)
    w3 = params["w3"][:, :A].astype(jnp.bfloat16)
    h1 = jnp.maximum(jnp.dot(x.astype(jnp.bfloat16), w1,
                             preferred_element_type=jnp.float32) + params["b1"], 0.0)
    h2 = jnp.maximum(jnp.dot(h1.astype(jnp.bfloat16), w2,
                             preferred_element_type=jnp.float32) + params["b2"], 0.0)
    y = jnp.dot(h2.astype(jnp.bfloat16), w3,
                preferred_element_type=jnp.float32) + params["b3"][:A]
    return jnp.tanh(y)


def reference_forward_f32(states, mean, std, params):
    x = jnp.clip((states - mean) / std, -5.0, 5.0)
    h1 = jnp.maximum(x @ params["w1"] + params["b1"], 0.0)
    h2 = jnp.maximum(h1 @ params["w2"] + params["b2"], 0.0)
    y = h2 @ params["w3"] + params["b3"]
    A = y.shape[-1] // 2
    return jnp.tanh(y[:, :A])


if __name__ == "__main__":
    B, D, A = 20, 16, 4                     # batch, state_dim, action_dim (small demo)
    key = jax.random.PRNGKey(0)
    key, ks = jax.random.split(key)

    states = jax.random.normal(ks, (B, D), jnp.float32) * 3.0
    mean = jnp.zeros((D,), jnp.float32)     # self.mean = torch.zeros(state_shape)
    std = jnp.ones((D,), jnp.float32)       # self.std  = torch.ones(state_shape)
    params = init_params(key, D, A, hidden_units=(256, 256))

    # tm=8 in the demo exercises the multi-step batch grid + tail padding
    # (production uses the default tm=256 to keep the MXU full-height).
    out = state_dependent_policy_forward(states, mean, std, params, tm=8)
    out = jax.block_until_ready(out)
    assert out.shape == (B, A)

    ref_bf16 = reference_forward_bf16(states, mean, std, params)
    assert jnp.allclose(out, ref_bf16, atol=2e-3, rtol=2e-3), "mismatch vs bf16 reference"

    ref_f32 = reference_forward_f32(states, mean, std, params)
    assert jnp.allclose(out, ref_f32, atol=5e-2, rtol=5e-2), "mismatch vs f32 reference"

    print("KERNEL_OK")
</pallas_src>

<mosaic_0001>
module attributes {stable_mosaic.version = 11 : i64} {
  func.func @policy_kernel(%arg0: i32, %arg1: memref<8x16xf32, #tpu.memory_space<vmem>>, %arg2: memref<1x16xf32, #tpu.memory_space<vmem>>, %arg3: memref<1x16xf32, #tpu.memory_space<vmem>>, %arg4: memref<16x256xbf16, #tpu.memory_space<vmem>>, %arg5: memref<1x256xf32, #tpu.memory_space<vmem>>, %arg6: memref<256x256xbf16, #tpu.memory_space<vmem>>, %arg7: memref<1x256xf32, #tpu.memory_space<vmem>>, %arg8: memref<256x4xbf16, #tpu.memory_space<vmem>>, %arg9: memref<1x4xf32, #tpu.memory_space<vmem>>, %arg10: memref<8x4xf32, #tpu.memory_space<vmem>>) attributes {dimension_semantics = [#tpu.dimension_semantics<parallel>], iteration_bounds = array<i64: 3>, scalar_prefetch = 0 : i64, scratch_operands = 0 : i64, tpu.core_type = #tpu.core_type<tc>, window_params = [{transform_indices = @transform_0, window_bounds = array<i64: 8, 16>}, {pipeline_mode = #tpu.pipeline_mode<synchronous>, transform_indices = @transform_1, window_bounds = array<i64: 1, 16>}, {pipeline_mode = #tpu.pipeline_mode<synchronous>, transform_indices = @transform_2, window_bounds = array<i64: 1, 16>}, {pipeline_mode = #tpu.pipeline_mode<synchronous>, transform_indices = @transform_3, window_bounds = array<i64: 16, 256>}, {pipeline_mode = #tpu.pipeline_mode<synchronous>, transform_indices = @transform_4, window_bounds = array<i64: 1, 256>}, {pipeline_mode = #tpu.pipeline_mode<synchronous>, transform_indices = @transform_5, window_bounds = array<i64: 256, 256>}, {pipeline_mode = #tpu.pipeline_mode<synchronous>, transform_indices = @transform_6, window_bounds = array<i64: 1, 256>}, {pipeline_mode = #tpu.pipeline_mode<synchronous>, transform_indices = @transform_7, window_bounds = array<i64: 256, 4>}, {pipeline_mode = #tpu.pipeline_mode<synchronous>, transform_indices = @transform_8, window_bounds = array<i64: 1, 4>}, {transform_indices = @transform_9, window_bounds = array<i64: 8, 4>}]} {
    %c0 = arith.constant 0 : index
    %c0_0 = arith.constant 0 : index
    %0 = vector.load %arg1[%c0, %c0_0] : memref<8x16xf32, #tpu.memory_space<vmem>>, vector<8x16xf32>
    %c0_1 = arith.constant 0 : index
    %c0_2 = arith.constant 0 : index
    %1 = vector.load %arg2[%c0_1, %c0_2] : memref<1x16xf32, #tpu.memory_space<vmem>>, vector<1x16xf32>
    %2 = vector.broadcast %1 : vector<1x16xf32> to vector<8x16xf32>
    %3 = arith.subf %0, %2 : vector<8x16xf32>
    %c0_3 = arith.constant 0 : index
    %c0_4 = arith.constant 0 : index
    %4 = vector.load %arg3[%c0_3, %c0_4] : memref<1x16xf32, #tpu.memory_space<vmem>>, vector<1x16xf32>
    %5 = vector.broadcast %4 : vector<1x16xf32> to vector<8x16xf32>
    %6 = arith.mulf %3, %5 : vector<8x16xf32>
    %cst = arith.constant -5.000000e+00 : f32
    %cst_5 = arith.constant 5.000000e+00 : f32
    %7 = vector.broadcast %cst : f32 to vector<8x16xf32>
    %8 = arith.maximumf %7, %6 : vector<8x16xf32>
    %9 = vector.broadcast %cst_5 : f32 to vector<8x16xf32>
    %10 = arith.minimumf %9, %8 : vector<8x16xf32>
    %11 = arith.truncf %10 : vector<8x16xf32> to vector<8x16xbf16>
    %c0_6 = arith.constant 0 : index
    %c0_7 = arith.constant 0 : index
    %12 = vector.load %arg4[%c0_6, %c0_7] : memref<16x256xbf16, #tpu.memory_space<vmem>>, vector<16x256xbf16>
    %cst_8 = arith.constant dense<0.000000e+00> : vector<8x256xf32>
    %13 = tpu.matmul %11, %12, %cst_8 {dimension_numbers = #tpu.dot_dimension_numbers<[1], [0], [0], [1], [0, 0, 1, 1], [], []>} : vector<8x16xbf16>, vector<16x256xbf16>, vector<8x256xf32> -> vector<8x256xf32>
    %c0_9 = arith.constant 0 : index
    %c0_10 = arith.constant 0 : index
    %14 = vector.load %arg5[%c0_9, %c0_10] : memref<1x256xf32, #tpu.memory_space<vmem>>, vector<1x256xf32>
    %15 = vector.broadcast %14 : vector<1x256xf32> to vector<8x256xf32>
    %16 = arith.addf %13, %15 : vector<8x256xf32>
    %cst_11 = arith.constant 0.000000e+00 : f32
    %17 = vector.broadcast %cst_11 : f32 to vector<8x256xf32>
    %18 = arith.maximumf %16, %17 : vector<8x256xf32>
    %19 = arith.truncf %18 : vector<8x256xf32> to vector<8x256xbf16>
    %c0_12 = arith.constant 0 : index
    %c0_13 = arith.constant 0 : index
    %20 = vector.load %arg6[%c0_12, %c0_13] : memref<256x256xbf16, #tpu.memory_space<vmem>>, vector<256x256xbf16>
    %cst_14 = arith.constant dense<0.000000e+00> : vector<8x256xf32>
    %21 = tpu.matmul %19, %20, %cst_14 {dimension_numbers = #tpu.dot_dimension_numbers<[1], [0], [0], [1], [0, 0, 1, 1], [], []>} : vector<8x256xbf16>, vector<256x256xbf16>, vector<8x256xf32> -> vector<8x256xf32>
    %c0_15 = arith.constant 0 : index
    %c0_16 = arith.constant 0 : index
    %22 = vector.load %arg7[%c0_15, %c0_16] : memref<1x256xf32, #tpu.memory_space<vmem>>, vector<1x256xf32>
    %23 = vector.broadcast %22 : vector<1x256xf32> to vector<8x256xf32>
    %24 = arith.addf %21, %23 : vector<8x256xf32>
    %cst_17 = arith.constant 0.000000e+00 : f32
    %25 = vector.broadcast %cst_17 : f32 to vector<8x256xf32>
    %26 = arith.maximumf %24, %25 : vector<8x256xf32>
    %27 = arith.truncf %26 : vector<8x256xf32> to vector<8x256xbf16>
    %c0_18 = arith.constant 0 : index
    %c0_19 = arith.constant 0 : index
    %28 = vector.load %arg8[%c0_18, %c0_19] : memref<256x4xbf16, #tpu.memory_space<vmem>>, vector<256x4xbf16>
    %cst_20 = arith.constant dense<0.000000e+00> : vector<8x4xf32>
    %29 = tpu.matmul %27, %28, %cst_20 {dimension_numbers = #tpu.dot_dimension_numbers<[1], [0], [0], [1], [0, 0, 1, 1], [], []>} : vector<8x256xbf16>, vector<256x4xbf16>, vector<8x4xf32> -> vector<8x4xf32>
    %c0_21 = arith.constant 0 : index
    %c0_22 = arith.constant 0 : index
    %30 = vector.load %arg9[%c0_21, %c0_22] : memref<1x4xf32, #tpu.memory_space<vmem>>, vector<1x4xf32>
    %31 = vector.broadcast %30 : vector<1x4xf32> to vector<8x4xf32>
    %32 = arith.addf %29, %31 : vector<8x4xf32>
    %33 = math.tanh %32 : vector<8x4xf32>
    %c0_23 = arith.constant 0 : index
    %c0_24 = arith.constant 0 : index
    %34 = vector.load %arg10[%c0_23, %c0_24] : memref<8x4xf32, #tpu.memory_space<vmem>>, vector<8x4xf32>
    tpu.vector_store %arg10[%c0_23, %c0_24], %33 {strides = array<i32>} : memref<8x4xf32, #tpu.memory_space<vmem>>, vector<8x4xf32>,
    return
  }
  func.func @transform_0(%arg0: i32) -> (i32, i32) {
    %c0_i32 = arith.constant 0 : i32
    %c0_i32_0 = arith.constant 0 : i32
    return %arg0, %c0_i32 : i32, i32
  }
  func.func @transform_1(%arg0: i32) -> (i32, i32) {
    %c0_i32 = arith.constant 0 : i32
    %c0_i32_0 = arith.constant 0 : i32
    %c0_i32_1 = arith.constant 0 : i32
    return %c0_i32, %c0_i32_0 : i32, i32
  }
  func.func @transform_2(%arg0: i32) -> (i32, i32) {
    %c0_i32 = arith.constant 0 : i32
    %c0_i32_0 = arith.constant 0 : i32
    %c0_i32_1 = arith.constant 0 : i32
    return %c0_i32, %c0_i32_0 : i32, i32
  }
  func.func @transform_3(%arg0: i32) -> (i32, i32) {
    %c0_i32 = arith.constant 0 : i32
    %c0_i32_0 = arith.constant 0 : i32
    %c0_i32_1 = arith.constant 0 : i32
    return %c0_i32, %c0_i32_0 : i32, i32
  }
  func.func @transform_4(%arg0: i32) -> (i32, i32) {
    %c0_i32 = arith.constant 0 : i32
    %c0_i32_0 = arith.constant 0 : i32
    %c0_i32_1 = arith.constant 0 : i32
    return %c0_i32, %c0_i32_0 : i32, i32
  }
  func.func @transform_5(%arg0: i32) -> (i32, i32) {
    %c0_i32 = arith.constant 0 : i32
    %c0_i32_0 = arith.constant 0 : i32
    %c0_i32_1 = arith.constant 0 : i32
    return %c0_i32, %c0_i32_0 : i32, i32
  }
  func.func @transform_6(%arg0: i32) -> (i32, i32) {
    %c0_i32 = arith.constant 0 : i32
    %c0_i32_0 = arith.constant 0 : i32
    %c0_i32_1 = arith.constant 0 : i32
    return %c0_i32, %c0_i32_0 : i32, i32
  }
  func.func @transform_7(%arg0: i32) -> (i32, i32) {
    %c0_i32 = arith.constant 0 : i32
    %c0_i32_0 = arith.constant 0 : i32
    %c0_i32_1 = arith.constant 0 : i32
    return %c0_i32, %c0_i32_0 : i32, i32
  }
  func.func @transform_8(%arg0: i32) -> (i32, i32) {
    %c0_i32 = arith.constant 0 : i32
    %c0_i32_0 = arith.constant 0 : i32
    %c0_i32_1 = arith.constant 0 : i32
    return %c0_i32, %c0_i32_0 : i32, i32
  }
  func.func @transform_9(%arg0: i32) -> (i32, i32) {
    %c0_i32 = arith.constant 0 : i32
    %c0_i32_0 = arith.constant 0 : i32
    return %arg0, %c0_i32 : i32, i32
  }
}

</mosaic_0001>

<bundles_post_ra>
// kernel: tpu_custom_call.1
= control target key start
LH: loop header
LB: loop body
LE: loop exit
PB: predicated region body
PF: predicated region fallthrough
CT: control target
= control target key end

     0   :  { %14 = vsyncpa [#allocation3], 0  ;;  %s1200_s30 = smov 0   ;;  %s1307_s0 = inlined_call_operand.vmem [shape: f32[24,16], index: 0, kind: input, shape index: {}]   ;;  %s1308_s1 = inlined_call_operand.vmem [shape: f32[1,16], index: 1, kind: input, shape index: {}]   ;;  %s1309_s2 = inlined_call_operand.vmem [shape: f32[1,16], index: 2, kind: input, shape index: {}]   ;;  %s1310_s3 = inlined_call_operand.vmem [shape: bf16[16,256], index: 3, kind: input, shape index: {}]   ;;  %s1311_s4 = inlined_call_operand.vmem [shape: f32[1,256], index: 4, kind: input, shape index: {}]   ;;  %s1312_s5 = inlined_call_operand.hbm [shape: bf16[256,256], index: 5, kind: input, shape index: {}]   ;;  %s1313_s6 = inlined_call_operand.vmem [shape: f32[1,256], index: 6, kind: input, shape index: {}]   ;;  %s1314_s7 = inlined_call_operand.vmem [shape: bf16[256,4], index: 7, kind: input, shape index: {}]   ;;  %s1315_s8 = inlined_call_operand.vmem [shape: f32[1,4], index: 8, kind: input, shape index: {}]   ;;  %s1316_s9 = inlined_call_operand.vmem [shape: f32[24,4], index: 9, kind: output, shape index: {}]  }
   0x1 LB: > { %s929_s10 = sadd.s32 4294967295, %s1144_s30   ;;  %p931_p0 = scmp.ge.s32.totalorder %s1144_s30, 1  ;;  %s1144_s30 = sphi %s1200_s30, %s20_s30  }
   0x2   : > { %p245_p1 = scmp.lt.s32.totalorder %s1144_s30, 4  ;;  %s1146_s11 = smov [#allocation2]  }
   0x3   : > { %s269_s12 = sshll.u32 %s1146_s11, 4  ;;  %p1025_p3 = scmp.eq.s32.totalorder %s929_s10, 0  ;;  %s270_s12 = int_to_ptr.vmem [resolvable:$true] %s269_s12 }
   0x4   : > { %p1208_p2 = pnand %p931_p0, %p245_p1  ;;  %s1119_s14 = scalar_lea.vmem %s270_s12, 4096 }
   0x5   : > { %p1120_p7 = scmp.ne.s32.totalorder %s270_s12, %s1119_s14  ;;  %p1127_p10 = scmp.lt.s32.totalorder %s270_s12, %s270_s12 }
   0x6   : > { %p1021_p4 = pneg %p1208_p2  ;;  %p1128_p11 = scmp.lt.s32.totalorder %s1119_s14, %s1119_s14 }
   0x8   : > { %p1022_p5 = pnand %p1025_p3, %p1021_p4  ;;  %p1129_p12 = por %p1128_p11, %p1127_p10 }
   0xa   : > { %p1110_p6 = pneg %p1022_p5 }
   0xc   : > { %p1122_p8 = pnand %p1120_p7, %p1110_p6 }
   0xe   : > { %p1123_p9 = pneg %p1122_p8 }
  0x10   : > { %p1130_p13 = pnand %p1129_p12, %p1123_p9 }
  0x12   : > { %1133 = shalt.err (!%p1130_p13)
}
  0x13   : > { %s1147_s15 = smov 128   ;;  %s1148_s16 = smov 8  }
  0x14   : > { %1024 = dma.hbm_to_vmem [thread:$0]  (!%p1022_p5), %s1312_s5, 4096, %s270_s12, [#allocation3], %s1147_s15, %s1147_s15, %s1148_s16  }
  0x15   : > { %301 = sbr.rel (%p1208_p2) target bundleno = 659 (0x293), region = 56 }
  0x1a   : > { %1139 = dma.done.wait (%p1025_p3), [#allocation3], 4096  }
  0x1b   : > { %1141 = vsyncadd (%p1025_p3), [#allocation3], 4294963200  ;;  %p335_p0 = scmp.lt.s32.totalorder %s929_s10, 2  ;;  %v1149_v0 = vmov 0   ;;  %v1039_v1 = vld [vmem:[%s1310_s3 + $0x4] ss:$8 sps:$4 sm:$0xff]   ;;  %v368_v54 = vlaneseq }
  0x1c   : > { %424 = vmatprep.mubr.bf16.mxu0 %v1149_v0  ;;  %v1041_v2 = vld [vmem:[%s1310_s3] ss:$8 sps:$4 sm:$0xff]   ;;  %406 = vmatprep.subr.bf16.mxu0 %v1039_v1  ;;  %v1042_v7 = vld [vmem:[#allocation2 + $0x74] ss:$8 sps:$4 sm:$0xff]   ;;  %v1044_v8 = vld [vmem:[#allocation2 + $0x70] ss:$8 sps:$4 sm:$0xff]  }
  0x1d   : > { %s1319_s10 = smov (!%p335_p0, %s929_s10), 2  ;;  %v938_v4 = vld [vmem:[%s1308_s1] ss:$0 sm:$0xff]  ;;  %407 = vmatpush1.bf16.msra.mxu0 %v1041_v2  ;;  %v1045_v10 = vld [vmem:[#allocation2 + $0x64] ss:$8 sps:$4 sm:$0xff]   ;;  %641 = vmatprep.subr.bf16.mxu1 %v1042_v7  ;;  %vm388_vm0 = vcmask 130048  }
  0x1e   : > { %s936_s19 = sshll.u32 %s1319_s10, 3  ;;  %v939_v6 = vld [vmem:[%s1309_s2] ss:$0 sm:$0xff]  ;;  %642 = vmatpush1.bf16.msra.mxu1 %v1044_v8  ;;  %v1048_v13 = vld [vmem:[#allocation2 + $0x54] ss:$8 sps:$4 sm:$0xff]   ;;  %v1094_v46 = vld [vmem:[%s1314_s7 + $0x68] sm:$0xff]  }
  0x1f   : > { %s338_s22 = scalar_lea.vmem %s1307_s0, %s936_s19  ;;  %v1047_v12 = vld [vmem:[#allocation2 + $0x60] ss:$8 sps:$4 sm:$0xff]   ;;  %643 = vmatprep.subr.bf16.mxu1 %v1045_v10  ;;  %v1050_v15 = vld [vmem:[#allocation2 + $0x50] ss:$8 sps:$4 sm:$0xff]   ;;  %v1051_v16 = vld [vmem:[#allocation2 + $0x44] ss:$8 sps:$4 sm:$0xff]   ;;  %s342_s16 = scalar_lea.vmem %s1316_s9, %s936_s19 }
  0x20   : > { %v344_v3 = vld [vmem:[%s338_s22] sm:$0xff]  ;;  %v1054_v18 = vld [vmem:[#allocation2 + $0x34] ss:$8 sps:$4 sm:$0xff]   ;;  %v1056_v19 = vld [vmem:[#allocation2 + $0x30] ss:$8 sps:$4 sm:$0xff]   ;;  %v369_v55 = vshrl.u32 %v368_v54, 7 }
  0x21   : > { %v352_v5 = vsub.f32 %v344_v3, %v938_v4  ;;  %v1053_v17 = vld [vmem:[#allocation2 + $0x40] ss:$8 sps:$4 sm:$0xff]   ;;  %v1057_v20 = vld [vmem:[#allocation2 + $0x24] ss:$8 sps:$4 sm:$0xff]   ;;  %v1060_v22 = vld [vmem:[#allocation2 + $0x14] ss:$8 sps:$4 sm:$0xff]  }
  0x22   : > { %644 = vmatpush1.bf16.msra.mxu1 %v1047_v12  ;;  %v1059_v21 = vld [vmem:[#allocation2 + $0x20] ss:$8 sps:$4 sm:$0xff]   ;;  %v1062_v23 = vld [vmem:[#allocation2 + $0x10] ss:$8 sps:$4 sm:$0xff]   ;;  %v1063_v24 = vld [vmem:[#allocation2 + $0x4] ss:$8 sps:$4 sm:$0xff]  }
  0x23   : > { %v360_v9 = vmul.f32 %v939_v6, %v352_v5  ;;  %645 = vmatprep.subr.bf16.mxu1 %v1048_v13  ;;  %v1065_v25 = vld [vmem:[#allocation2] ss:$8 sps:$4 sm:$0xff]   ;;  %v1066_v26 = vld [vmem:[#allocation2 + $0xf4] ss:$8 sps:$4 sm:$0xff]   ;;  %v1068_v27 = vld [vmem:[#allocation2 + $0xf0] ss:$8 sps:$4 sm:$0xff]  }
  0x24   : > { %v1069_v28 = vld [vmem:[#allocation2 + $0xe4] ss:$8 sps:$4 sm:$0xff]   ;;  %v1071_v29 = vld [vmem:[#allocation2 + $0xe0] ss:$8 sps:$4 sm:$0xff]   ;;  %v1072_v30 = vld [vmem:[#allocation2 + $0xd4] ss:$8 sps:$4 sm:$0xff]  }
  0x25   : > { %v940_v11 = vclamps-f32 %v360_v9, 5.0  ;;  %v1074_v31 = vld [vmem:[#allocation2 + $0xd0] ss:$8 sps:$4 sm:$0xff]   ;;  %v1075_v32 = vld [vmem:[#allocation2 + $0xc4] ss:$8 sps:$4 sm:$0xff]   ;;  %v370_v56 = vsub.s32 0, %v369_v55 }
  0x26   : > { %646 = vmatpush1.bf16.msra.mxu1 %v1050_v15  ;;  %v1077_v33 = vld [vmem:[#allocation2 + $0xc0] ss:$8 sps:$4 sm:$0xff]   ;;  %v1078_v34 = vld [vmem:[#allocation2 + $0xb4] ss:$8 sps:$4 sm:$0xff]   ;;  %v1080_v35 = vld [vmem:[#allocation2 + $0xb0] ss:$8 sps:$4 sm:$0xff]  }
  0x27   : > { %v363_v14 = vpack.c.bf16 %v940_v11, %v940_v11  ;;  %647 = vmatprep.subr.bf16.mxu1 %v1051_v16  ;;  %v1081_v36 = vld [vmem:[#allocation2 + $0xa4] ss:$8 sps:$4 sm:$0xff]   ;;  %v1083_v37 = vld [vmem:[#allocation2 + $0xa0] ss:$8 sps:$4 sm:$0xff]   ;;  %v1084_v38 = vld [vmem:[#allocation2 + $0x94] ss:$8 sps:$4 sm:$0xff]  }
  0x28   : > { %v1086_v39 = vld [vmem:[#allocation2 + $0x90] ss:$8 sps:$4 sm:$0xff]   ;;  %v1087_v40 = vld [vmem:[#allocation2 + $0x84] ss:$8 sps:$4 sm:$0xff]   ;;  %v1089_v41 = vld [vmem:[#allocation2 + $0x80] ss:$8 sps:$4 sm:$0xff]  }
  0x29   : > { %943 = vmatmul.mubr.msk.bf16.vlgmr.msra.gmra.mxu0 %vm388_vm0, %v363_v14  ;;  %v1090_v42 = vld [vmem:[%s1314_s7 + $0x78] sm:$0xff]   ;;  %v1092_v44 = vld [vmem:[%s1314_s7 + $0x70] sm:$0xff]   ;;  %v1095_v47 = vld [vmem:[%s1314_s7 + $0x28] sm:$0xff]   ;;  %v374_v58 = vsub.s32 1, %v369_v55  ;;  %vm862_vm1 = vcmask 31744  }
  0x2a   : > { %648 = vmatpush1.bf16.msra.mxu1 %v1053_v17  ;;  %v1091_v43 = vld [vmem:[%s1314_s7 + $0x38] sm:$0xff]   ;;  %995 = vmatprep.subr.bf16.mxu0 %v1090_v42  ;;  %v1093_v45 = vld [vmem:[%s1314_s7 + $0x30] sm:$0xff]   ;;  %v1096_v48 = vld [vmem:[%s1314_s7 + $0x60] sm:$0xff]  }
  0x2b   : > { %649 = vmatprep.subr.bf16.mxu1 %v1054_v18  ;;  %996 = vmatpush3.bf16.msra.mxu0 %v1091_v43  ;;  %v1097_v49 = vld [vmem:[%s1314_s7 + $0x20] sm:$0xff]   ;;  %v1098_v50 = vld [vmem:[%s1314_s7 + $0x58] sm:$0xff]   ;;  %v1100_v52 = vld [vmem:[%s1314_s7 + $0x50] sm:$0xff]  }
  0x2c   : > { %997 = vmatprep.subr.bf16.mxu0 %v1092_v44  ;;  %v1099_v51 = vld [vmem:[%s1314_s7 + $0x18] sm:$0xff]   ;;  %v1101_v53 = vld [vmem:[%s1314_s7 + $0x10] sm:$0xff]   ;;  %v366_v57 = vld [vmem:[%s1311_s4] sm:$0x3] }
  0x2d   : > { %v371_v59 = vrot.slane %v366_v57, %v370_v56  ;;  %v375_v60 = vrot.slane %v366_v57, %v374_v58  ;;  %v1102_v7 = vld [vmem:[%s1314_s7 + $0x48] sm:$0xff]   ;;  %v1104_v9 = vld [vmem:[%s1314_s7 + $0x40] sm:$0xff]  }
  0x2e   : > { %650 = vmatpush1.bf16.msra.mxu1 %v1056_v19  ;;  %v1103_v8 = vld [vmem:[%s1314_s7 + $0x8] sm:$0xff]   ;;  %v1105_v10 = vld [vmem:[%s1314_s7] sm:$0xff]  }
  0x2f   : > { %651 = vmatprep.subr.bf16.mxu1 %v1057_v20  ;;  %998 = vmatpush3.bf16.msra.mxu0 %v1093_v45  ;;  %v469_v11 = vld [vmem:[%s1313_s6] sm:$0x3] }
  0x30   : > { %999 = vmatprep.subr.bf16.mxu0 %v1094_v46  ;;  %v474_v12 = vrot.slane %v469_v11, %v370_v56  ;;  %v478_v13 = vrot.slane %v469_v11, %v374_v58 }
  0x32   : > { %652 = vmatpush1.bf16.msra.mxu1 %v1059_v21 }
  0x33   : > { %653 = vmatprep.subr.bf16.mxu1 %v1060_v22  ;;  %1000 = vmatpush3.bf16.msra.mxu0 %v1095_v47 }
  0x34   : > { %1001 = vmatprep.subr.bf16.mxu0 %v1096_v48 }
  0x36   : > { %654 = vmatpush1.bf16.msra.mxu1 %v1062_v23 }
  0x37   : > { %655 = vmatprep.subr.bf16.mxu1 %v1063_v24  ;;  %1002 = vmatpush3.bf16.msra.mxu0 %v1097_v49 }
  0x38   : > { %1003 = vmatprep.subr.bf16.mxu0 %v1098_v50 }
  0x3a   : > { %656 = vmatpush1.bf16.msra.mxu1 %v1065_v25  ;;  %v976_v25 = vld [vmem:[%s1315_s8] ss:$0 sm:$0xff] }
  0x3b   : > { %657 = vmatprep.subr.bf16.mxu1 %v1066_v26  ;;  %1004 = vmatpush3.bf16.msra.mxu0 %v1099_v51 }
  0x3c   : > { %1005 = vmatprep.subr.bf16.mxu0 %v1100_v52 }
  0x3e   : > { %658 = vmatpush2.bf16.msra.mxu1 %v1068_v27 }
  0x3f   : > { %659 = vmatprep.subr.bf16.mxu1 %v1069_v28  ;;  %1006 = vmatpush3.bf16.msra.mxu0 %v1101_v53 }
  0x40   : > { %1007 = vmatprep.subr.bf16.mxu0 %v1102_v7 }
  0x42   : > { %660 = vmatpush2.bf16.msra.mxu1 %v1071_v29 }
  0x43   : > { %661 = vmatprep.subr.bf16.mxu1 %v1072_v30  ;;  %1008 = vmatpush3.bf16.msra.mxu0 %v1103_v8 }
  0x44   : > { %1009 = vmatprep.subr.bf16.mxu0 %v1104_v9 }
  0x46   : > { %662 = vmatpush2.bf16.msra.mxu1 %v1074_v31 }
  0x47   : > { %663 = vmatprep.subr.bf16.mxu1 %v1075_v32  ;;  %1010 = vmatpush3.bf16.msra.mxu0 %v1105_v10 }
  0x4a   : > { %664 = vmatpush2.bf16.msra.mxu1 %v1077_v33 }
  0x4b   : > { %665 = vmatprep.subr.bf16.mxu1 %v1078_v34 }
  0x4e   : > { %666 = vmatpush2.bf16.msra.mxu1 %v1080_v35 }
  0x4f   : > { %667 = vmatprep.subr.bf16.mxu1 %v1081_v36 }
  0x52   : > { %668 = vmatpush2.bf16.msra.mxu1 %v1083_v37 }
  0x53   : > { %669 = vmatprep.subr.bf16.mxu1 %v1084_v38 }
  0x56   : > { %670 = vmatpush2.bf16.msra.mxu1 %v1086_v39 }
  0x57   : > { %671 = vmatprep.subr.bf16.mxu1 %v1087_v40 }
  0x5a   : > { %672 = vmatpush2.bf16.msra.mxu1 %v1089_v41 }
  0xe9   : > { %v426_v61 = vpop.f32.mrf.mxu0 }
  0xea   : > { %v427_v62 = vadd.f32 %v426_v61, %v371_v59 }
  0xeb   : > { %v428_v63 = vpop.f32.mrf.mxu0 }
  0xec   : > { %v429_v0 = vadd.f32 %v428_v63, %v375_v60  ;;  %v433_v1 = vmax.f32 %v427_v62, 0.0 }
  0xed   : > { %v430_v2 = vpop.f32.mrf.mxu0 }
  0xee   : > { %v434_v3 = vmax.f32 %v429_v0, 0.0  ;;  %v435_v6 = vpack.c.bf16 %v433_v1, %v433_v1 }
  0xef   : > { %v431_v4 = vpop.f32.mrf.mxu0 }
  0xf0   : > { %v436_v5 = vpack.c.bf16 %v434_v3, %v434_v3 }
  0xf2   : > { %673 = vmatprep.mubr.bf16.mxu1 %v436_v5 }
  0xf3   : > { %674 = vmatmul.mubr.bf16.vlgmr.msra.gmra.mxu1 %v435_v6 }
 0x1b3   : > { %v675_v14 = vpop.f32.mrf.mxu1 }
 0x1b4   : > { %v676_v15 = vadd.f32 %v675_v14, %v474_v12 }
 0x1b5   : > { %v677_v16 = vpop.f32.mrf.mxu1 }
 0x1b6   : > { %v678_v17 = vadd.f32 %v677_v16, %v478_v13  ;;  %v682_v18 = vmax.f32 %v676_v15, 0.0 }
 0x1b7   : > { %v679_v19 = vpop.f32.mrf.mxu1 }
 0x1b8   : > { %v683_v20 = vmax.f32 %v678_v17, 0.0  ;;  %v684_v23 = vpack.c.bf16 %v682_v18, %v682_v18 }
 0x1b9   : > { %v680_v21 = vpop.f32.mrf.mxu1 }
 0x1ba   : > { %v685_v22 = vpack.c.bf16 %v683_v20, %v683_v20 }
 0x1bc   : > { %853 = vmatprep.mubr.bf16.mxu0 %v685_v22 }
 0x1bd   : > { %854 = vmatmul.mubr.bf16.vlgmr.msra.gmra.mxu0 %v684_v23 }
 0x27d   : > { %v1011_v24 = vpop.f32.mrf.mxu0 }
 0x27f   : > { %v1012_v26 = vpop.f32.mrf.mxu0 }
 0x280   : > { %v1013_v27 = vadd.f32 %v1012_v26, %v1011_v24 }
 0x281   : > { %v1014_v28 = vpop.f32.mrf.mxu0 }
 0x282   : > { %v856_v29 = vadd.f32 %v1013_v27, %v976_v25 }
 0x283   : > { %v1015_v30 = vpop.f32.mrf.mxu0 }
 0x284   : > { %1106 = vtanh.f32 %v856_v29 }
 0x291   : > { %v1107_v31 = vpop.eup %1106 }
 0x292   : > { %863 = vst.msk [vmem:[%s342_s16] sm:$0xff] %vm862_vm1, %v1107_v31 }
 0x293 PF: > { %s20_s30 = sadd.s32 1, %s1144_s30  }
 0x294   : > { %p17_p1 = scmp.ge.s32.totalorder %s20_s30, 5  }
 0x296   :  { %19 = sbr.rel (!%p17_p1) target bundleno = 1 (0x1), region = 91 }
 0x29b   :  { %883 = vsyncpa [#allocation3], 1 }
 0x29c   :  { %885 = vsyncpa [#allocation3 + $0x1], 1 }

</bundles_post_ra>
